<compile_context>
chip_gen: v6e
topology: v6e:2x2x1
jax: 0.10.0
libtpu: 0.0.40
codegen_flags: <defaults>
</compile_context>

<pallas_src>
import math

import jax
import jax.numpy as jnp
from jax import lax
from jax.experimental import pallas as pl
from jax.experimental.pallas import tpu as pltpu

NEG_SLOPE = 0.01  # PyTorch F.leaky_relu default


def _pick_tiles(H, W, reach, B):
    """Choose padded width Wp and row-tile height TH (TH*Wp % 128 == 0 when possible)."""
    Wp = W + 2 * reach
    Wp = ((Wp + 31) // 32) * 32                     # lane-friendly padded width
    th_step = 128 // math.gcd(Wp, 128)              # smallest TH with TH*Wp % 128 == 0
    try:
        vmem_bytes = int(pltpu.get_tpu_info().vmem_capacity_bytes)
    except Exception:
        vmem_bytes = 64 << 20                       # conservative (v7x per-TC VMEM)
    # ~240 bytes of per-step VMEM per output lane (windows 2x, out 2x, slab, temps);
    # only claim 1/8 of physical VMEM so compiler temps / pipelining have headroom.
    max_lanes = max(128, (vmem_bytes // 8) // 240)
    target_rows = min(8192, max_lanes) // Wp
    target_rows = max(th_step, (target_rows // th_step) * th_step)
    if B < 4 and H > th_step:
        # guarantee >=2 spatial tiles at small batch so v7x's two TCs both get work
        target_rows = min(target_rows, max(th_step, (H // 2 // th_step) * th_step))
    TH = min(target_rows, ((H + th_step - 1) // th_step) * th_step)
    H_pad = ((H + TH - 1) // TH) * TH
    NT = H_pad // TH
    return Wp, TH, H_pad, NT


def make_causal_conv_kernel(reach, Wp, TH, n_res, ntaps, K_pad):
    """Kernel for one (batch, row-tile) grid point."""
    THWp = TH * Wp
    KT_W = 2 * reach + 1

    def kernel(*refs):
        # refs = window, wfront, [w_res, b_res,] wf, bf, out
        win_ref, wfront_ref = refs[0], refs[1]
        idx = 2
        if n_res > 0:
            wres_ref, bres_ref = refs[idx], refs[idx + 1]
            idx += 2
        wf_ref, bf_ref = refs[idx], refs[idx + 1]
        out_ref = refs[idx + 2]

        # ---- im2col as values (no scratch round trip): every causal tap is a
        #      contiguous static slice of the 1-D halo window (row stride = Wp).
        rows = []
        for di in range(reach):                  # conv00T taps (rows strictly above)
            for dj in range(KT_W):
                s = di * Wp + dj
                rows.append(win_ref[0, s:s + THWp])
        for dj in range(reach):                  # conv00L taps (cols strictly left)
            s = reach * Wp + dj
            rows.append(win_ref[0, s:s + THWp])
        rows.append(jnp.ones((THWp,), jnp.float32))        # folded conv00T bias row
        for _ in range(K_pad - ntaps - 1):                  # deterministic K padding
            rows.append(jnp.zeros((THWp,), jnp.float32))
        slab = jnp.stack(rows, axis=0)                      # (K_pad, THWp)

        # ---- front conv (+bias) as one MXU matmul, leaky relu on the VPU
        # TODO(synk): optionally cast slab/h to bf16 (keep f32 accumulation) to halve
        # VMEM/vreg pressure; kept f32 here for tight agreement with the reference.
        h = jnp.dot(wfront_ref[...], slab, preferred_element_type=jnp.float32)
        h = jnp.maximum(h, NEG_SLOPE * h)                   # leaky: 2 VPU ops

        # ---- residual 1x1 layers; identity already folded into the weights
        for l in range(n_res):
            y = jnp.dot(wres_ref[l], h, preferred_element_type=jnp.float32) + bres_ref[l]
            h = jnp.maximum(y, NEG_SLOPE * y)

        # ---- clamped "final" 1x1 layer (= conv(nlayers-2) due to shadowing)
        y = jnp.dot(wf_ref[...], h, preferred_element_type=jnp.float32) + bf_ref[...]
        out_ref[...] = jnp.clip(y, -1.0, 1.0)

    return kernel


def init_params(key, reach, nlayers, nch):
    """Deterministic init mirroring PyTorch Conv2d default U(-1/sqrt(fan), +1/sqrt(fan))."""
    keys = iter(jax.random.split(key, 2 * nlayers + 8))

    def unif(shape, fan_in):
        bound = 1.0 / (fan_in ** 0.5)
        return jax.random.uniform(next(keys), shape, jnp.float32, -bound, bound)

    params = {}
    fanT = 1 * reach * (2 * reach + 1)
    params["wT"] = unif((nch, 1, reach, 2 * reach + 1), fanT)   # conv00T weight (OIHW)
    params["bT"] = unif((nch,), fanT)                           # conv00T bias
    params["wL"] = unif((nch, 1, 1, reach), 1 * reach)          # conv00L weight (no bias)
    mids = []
    for _ in range(1, nlayers - 1):                             # conv01 .. conv(nlayers-2)
        mids.append((unif((nch, nch, 1, 1), nch), unif((nch,), nch)))
    params["mid"] = mids
    # conv(nlayers-1): nch->1.  Defined by __init__ but never used by forward()
    # because of the `nlayers = len(self.layers)` shadowing; kept only for fidelity.
    params["unused_final"] = (unif((1, nch, 1, 1), nch), unif((1,), nch))
    return params


def causal_conv_forward(x, params, reach, nlayers, nch):
    """x: (B, 1, H, W) float32 NCHW -> (B, nch, H, W) float32."""
    B, C, H, W = x.shape
    assert C == 1
    KT_W = 2 * reach + 1
    ntaps = reach * KT_W + reach
    K_pad = ((ntaps + 1 + 7) // 8) * 8              # taps + bias row, padded to 8

    Wp, TH, H_pad, NT = _pick_tiles(H, W, reach, B)
    THWp = TH * Wp
    S_t = (TH + reach) * Wp + 2 * reach             # per-tile halo window length

    # Faithful to forward(): residual loop uses conv01..conv(nlayers-3);
    # clamped output layer is conv(nlayers-2) (nch->nch).
    n_res = nlayers - 3
    assert n_res >= 0 and len(params["mid"]) == nlayers - 2
    res_layers = params["mid"][:n_res]
    w_final_oihw, b_final = params["mid"][n_res]
    n_out = w_final_oihw.shape[0]

    # ---- single zero-padded copy of the input (1x HBM traffic) -------------------
    # xp[b, i+reach, j+reach] = x[b, 0, i, j]; right pad up to the lane-friendly Wp.
    xs = jnp.pad(x[:, 0], ((0, 0), (0, H_pad - H), (0, 0)))
    xp = jnp.pad(xs, ((0, 0), (reach, 0), (reach, Wp - W - reach)))  # (B, H_pad+reach, Wp)
    flat = jnp.pad(xp.reshape(B, (H_pad + reach) * Wp), ((0, 0), (0, 2 * reach)))
    # Overlapping per-row-tile windows (reach-row halo); each is a contiguous slice.
    windows = jnp.stack(
        [flat[:, t * THWp:t * THWp + S_t] for t in range(NT)], axis=1)   # (B, NT, S_t)
    windows = windows[:, :, None, :]                                     # (B, NT, 1, S_t)

    # ---- weight packing: front conv + bias as one (nch, K_pad) matrix ------------
    wT_flat = params["wT"][:, 0].reshape(nch, reach * KT_W)     # di-major, dj-minor
    wL_flat = params["wL"][:, 0, 0]                             # (nch, reach)
    bT_col = params["bT"].reshape(nch, 1)                       # matches the ones row
    wfront = jnp.concatenate([wT_flat, wL_flat, bT_col], axis=1)
    wfront = jnp.pad(wfront, ((0, 0), (0, K_pad - (ntaps + 1))))  # zero cols for pad rows

    inputs = [windows, wfront]
    if n_res > 0:
        eye = jnp.eye(nch, dtype=jnp.float32)
        w_res = jnp.stack([w[:, :, 0, 0] + eye for (w, _) in res_layers])  # skip folded in
        b_res = jnp.stack([b for (_, b) in res_layers]).reshape(n_res, nch, 1)
        inputs += [w_res, b_res]
    wf = w_final_oihw[:, :, 0, 0]                               # (n_out, nch)
    bf = b_final.reshape(n_out, 1)
    inputs += [wf, bf]

    kernel = make_causal_conv_kernel(reach, Wp, TH, n_res, ntaps, K_pad)

    def full_spec(a):
        nd = a.ndim
        return pl.BlockSpec(a.shape, lambda b, t, _nd=nd: (0,) * _nd)

    # TODO(synk): if an xprof trace shows exposed DMA on the window input for very
    # large images, add pipeline_mode=pl.Buffered(3) to its BlockSpec.
    in_specs = [pl.BlockSpec((None, None, 1, S_t), lambda b, t: (b, t, 0, 0))]
    in_specs += [full_spec(a) for a in inputs[1:]]

    out = pl.pallas_call(
        kernel,
        out_shape=jax.ShapeDtypeStruct((B, NT, n_out, THWp), jnp.float32),
        grid=(B, NT),
        in_specs=in_specs,
        out_specs=pl.BlockSpec((None, None, n_out, THWp), lambda b, t: (b, t, 0, 0)),
        compiler_params=pltpu.CompilerParams(
            dimension_semantics=("parallel", "parallel")),
    )(*inputs)

    # (B, NT, nch, TH*Wp) -> (B, nch, H, W): drop the wide-output junk columns and
    # the bottom row padding (causal taps only look up/left, so they never leak in).
    out = out.reshape(B, NT, n_out, TH, Wp)
    out = out.transpose(0, 2, 1, 3, 4).reshape(B, n_out, H_pad, Wp)
    return out[:, :, :H, :W]


def reference_forward(x, params, reach, nlayers):
    """Pure-JAX mirror of the PyTorch forward (incl. the nlayers shadowing)."""
    dn = ("NCHW", "OIHW", "NCHW")
    conv = lambda inp, w: lax.conv_general_dilated(inp, w, (1, 1), "VALID",
                                                   dimension_numbers=dn)
    xt_in = jnp.pad(x[:, :, :-1, :], ((0, 0), (0, 0), (reach, 0), (reach, reach)))
    xt = conv(xt_in, params["wT"]) + params["bT"].reshape(1, -1, 1, 1)
    xl_in = jnp.pad(x[:, :, :, :-1], ((0, 0), (0, 0), (0, 0), (reach, 0)))
    xl = conv(xl_in, params["wL"])
    h = jax.nn.leaky_relu(xt + xl, NEG_SLOPE)
    n_res = nlayers - 3
    for (w, b) in params["mid"][:n_res]:
        h = jax.nn.leaky_relu(conv(h, w) + b.reshape(1, -1, 1, 1) + h, NEG_SLOPE)
    wf, bf = params["mid"][n_res]
    return jnp.clip(conv(h, wf) + bf.reshape(1, -1, 1, 1), -1.0, 1.0)


if __name__ == "__main__":
    reach, nlayers, nch = 2, 4, 8
    B, H, W = 2, 16, 16

    key = jax.random.PRNGKey(0)
    kp, kx = jax.random.split(key)
    params = init_params(kp, reach, nlayers, nch)
    x = jax.random.normal(kx, (B, 1, H, W), jnp.float32)

    out = jax.block_until_ready(causal_conv_forward(x, params, reach, nlayers, nch))
    ref = jax.block_until_ready(reference_forward(x, params, reach, nlayers))

    assert out.shape == ref.shape == (B, nch, H, W)
    err = float(jnp.max(jnp.abs(out - ref)))
    # Tolerance budgets for the default MXU precision on f32 inputs (possible bf16
    # passes); structural bugs (wrong tap / weight order / missing residual) produce
    # O(0.1-1) diffs.  Pass precision=lax.Precision.HIGHEST to the dots if
    # bit-faithfulness to f32 PyTorch is required.
    assert err < 5e-2, f"max abs diff = {err}"
    print("KERNEL_OK")
</pallas_src>

<mosaic_0001>
module attributes {stable_mosaic.version = 11 : i64} {
  func.func @kernel(%arg0: i32, %arg1: i32, %arg2: memref<1x1x1x324xf32, #tpu.memory_space<vmem>>, %arg3: memref<8x16xf32, #tpu.memory_space<vmem>>, %arg4: memref<1x8x8xf32, #tpu.memory_space<vmem>>, %arg5: memref<1x8x1xf32, #tpu.memory_space<vmem>>, %arg6: memref<8x8xf32, #tpu.memory_space<vmem>>, %arg7: memref<8x1xf32, #tpu.memory_space<vmem>>, %arg8: memref<1x1x8x256xf32, #tpu.memory_space<vmem>>) attributes {dimension_semantics = [#tpu.dimension_semantics<parallel>, #tpu.dimension_semantics<parallel>], iteration_bounds = array<i64: 2, 2>, scalar_prefetch = 0 : i64, scratch_operands = 0 : i64, tpu.core_type = #tpu.core_type<tc>, window_params = [{transform_indices = @transform_0, window_bounds = array<i64: 1, 1, 1, 324>}, {pipeline_mode = #tpu.pipeline_mode<synchronous>, transform_indices = @transform_1, window_bounds = array<i64: 8, 16>}, {pipeline_mode = #tpu.pipeline_mode<synchronous>, transform_indices = @transform_2, window_bounds = array<i64: 1, 8, 8>}, {pipeline_mode = #tpu.pipeline_mode<synchronous>, transform_indices = @transform_3, window_bounds = array<i64: 1, 8, 1>}, {pipeline_mode = #tpu.pipeline_mode<synchronous>, transform_indices = @transform_4, window_bounds = array<i64: 8, 8>}, {pipeline_mode = #tpu.pipeline_mode<synchronous>, transform_indices = @transform_5, window_bounds = array<i64: 8, 1>}, {transform_indices = @transform_6, window_bounds = array<i64: 1, 1, 8, 256>}]} {
    %c0 = arith.constant 0 : index
    %c0_0 = arith.constant 0 : index
    %c0_1 = arith.constant 0 : index
    %c0_2 = arith.constant 0 : index
    %0 = vector.load %arg2[%c0, %c0_0, %c0_1, %c0_2] : memref<1x1x1x324xf32, #tpu.memory_space<vmem>>, vector<1x1x1x256xf32>
    %1 = vector.shape_cast %0 : vector<1x1x1x256xf32> to vector<256xf32>
    %c0_3 = arith.constant 0 : index
    %c0_4 = arith.constant 0 : index
    %c0_5 = arith.constant 0 : index
    %c1 = arith.constant 1 : index
    %2 = vector.load %arg2[%c0_3, %c0_4, %c0_5, %c1] : memref<1x1x1x324xf32, #tpu.memory_space<vmem>>, vector<1x1x1x256xf32>
    %3 = vector.shape_cast %2 : vector<1x1x1x256xf32> to vector<256xf32>
    %c0_6 = arith.constant 0 : index
    %c0_7 = arith.constant 0 : index
    %c0_8 = arith.constant 0 : index
    %c2 = arith.constant 2 : index
    %4 = vector.load %arg2[%c0_6, %c0_7, %c0_8, %c2] : memref<1x1x1x324xf32, #tpu.memory_space<vmem>>, vector<1x1x1x256xf32>
    %5 = vector.shape_cast %4 : vector<1x1x1x256xf32> to vector<256xf32>
    %c0_9 = arith.constant 0 : index
    %c0_10 = arith.constant 0 : index
    %c0_11 = arith.constant 0 : index
    %c3 = arith.constant 3 : index
    %6 = vector.load %arg2[%c0_9, %c0_10, %c0_11, %c3] : memref<1x1x1x324xf32, #tpu.memory_space<vmem>>, vector<1x1x1x256xf32>
    %7 = vector.shape_cast %6 : vector<1x1x1x256xf32> to vector<256xf32>
    %c0_12 = arith.constant 0 : index
    %c0_13 = arith.constant 0 : index
    %c0_14 = arith.constant 0 : index
    %c4 = arith.constant 4 : index
    %8 = vector.load %arg2[%c0_12, %c0_13, %c0_14, %c4] : memref<1x1x1x324xf32, #tpu.memory_space<vmem>>, vector<1x1x1x256xf32>
    %9 = vector.shape_cast %8 : vector<1x1x1x256xf32> to vector<256xf32>
    %c0_15 = arith.constant 0 : index
    %c0_16 = arith.constant 0 : index
    %c0_17 = arith.constant 0 : index
    %c32 = arith.constant 32 : index
    %10 = vector.load %arg2[%c0_15, %c0_16, %c0_17, %c32] : memref<1x1x1x324xf32, #tpu.memory_space<vmem>>, vector<1x1x1x256xf32>
    %11 = vector.shape_cast %10 : vector<1x1x1x256xf32> to vector<256xf32>
    %c0_18 = arith.constant 0 : index
    %c0_19 = arith.constant 0 : index
    %c0_20 = arith.constant 0 : index
    %c33 = arith.constant 33 : index
    %12 = vector.load %arg2[%c0_18, %c0_19, %c0_20, %c33] : memref<1x1x1x324xf32, #tpu.memory_space<vmem>>, vector<1x1x1x256xf32>
    %13 = vector.shape_cast %12 : vector<1x1x1x256xf32> to vector<256xf32>
    %c0_21 = arith.constant 0 : index
    %c0_22 = arith.constant 0 : index
    %c0_23 = arith.constant 0 : index
    %c34 = arith.constant 34 : index
    %14 = vector.load %arg2[%c0_21, %c0_22, %c0_23, %c34] : memref<1x1x1x324xf32, #tpu.memory_space<vmem>>, vector<1x1x1x256xf32>
    %15 = vector.shape_cast %14 : vector<1x1x1x256xf32> to vector<256xf32>
    %c0_24 = arith.constant 0 : index
    %c0_25 = arith.constant 0 : index
    %c0_26 = arith.constant 0 : index
    %c35 = arith.constant 35 : index
    %16 = vector.load %arg2[%c0_24, %c0_25, %c0_26, %c35] : memref<1x1x1x324xf32, #tpu.memory_space<vmem>>, vector<1x1x1x256xf32>
    %17 = vector.shape_cast %16 : vector<1x1x1x256xf32> to vector<256xf32>
    %c0_27 = arith.constant 0 : index
    %c0_28 = arith.constant 0 : index
    %c0_29 = arith.constant 0 : index
    %c36 = arith.constant 36 : index
    %18 = vector.load %arg2[%c0_27, %c0_28, %c0_29, %c36] : memref<1x1x1x324xf32, #tpu.memory_space<vmem>>, vector<1x1x1x256xf32>
    %19 = vector.shape_cast %18 : vector<1x1x1x256xf32> to vector<256xf32>
    %c0_30 = arith.constant 0 : index
    %c0_31 = arith.constant 0 : index
    %c0_32 = arith.constant 0 : index
    %c64 = arith.constant 64 : index
    %20 = vector.load %arg2[%c0_30, %c0_31, %c0_32, %c64] : memref<1x1x1x324xf32, #tpu.memory_space<vmem>>, vector<1x1x1x256xf32>
    %21 = vector.shape_cast %20 : vector<1x1x1x256xf32> to vector<256xf32>
    %c0_33 = arith.constant 0 : index
    %c0_34 = arith.constant 0 : index
    %c0_35 = arith.constant 0 : index
    %c65 = arith.constant 65 : index
    %22 = vector.load %arg2[%c0_33, %c0_34, %c0_35, %c65] : memref<1x1x1x324xf32, #tpu.memory_space<vmem>>, vector<1x1x1x256xf32>
    %23 = vector.shape_cast %22 : vector<1x1x1x256xf32> to vector<256xf32>
    %cst = arith.constant 1.000000e+00 : f32
    %24 = vector.broadcast %cst : f32 to vector<256xf32>
    %cst_36 = arith.constant 0.000000e+00 : f32
    %25 = vector.broadcast %cst_36 : f32 to vector<256xf32>
    %cst_37 = arith.constant 0.000000e+00 : f32
    %26 = vector.broadcast %cst_37 : f32 to vector<256xf32>
    %cst_38 = arith.constant 0.000000e+00 : f32
    %27 = vector.broadcast %cst_38 : f32 to vector<256xf32>
    %28 = vector.shape_cast %1 : vector<256xf32> to vector<1x256xf32>
    %29 = vector.shape_cast %3 : vector<256xf32> to vector<1x256xf32>
    %30 = vector.shape_cast %5 : vector<256xf32> to vector<1x256xf32>
    %31 = vector.shape_cast %7 : vector<256xf32> to vector<1x256xf32>
    %32 = vector.shape_cast %9 : vector<256xf32> to vector<1x256xf32>
    %33 = vector.shape_cast %11 : vector<256xf32> to vector<1x256xf32>
    %34 = vector.shape_cast %13 : vector<256xf32> to vector<1x256xf32>
    %35 = vector.shape_cast %15 : vector<256xf32> to vector<1x256xf32>
    %36 = vector.shape_cast %17 : vector<256xf32> to vector<1x256xf32>
    %37 = vector.shape_cast %19 : vector<256xf32> to vector<1x256xf32>
    %38 = vector.shape_cast %21 : vector<256xf32> to vector<1x256xf32>
    %39 = vector.shape_cast %23 : vector<256xf32> to vector<1x256xf32>
    %40 = vector.shape_cast %24 : vector<256xf32> to vector<1x256xf32>
    %41 = vector.shape_cast %25 : vector<256xf32> to vector<1x256xf32>
    %42 = vector.shape_cast %26 : vector<256xf32> to vector<1x256xf32>
    %43 = vector.shape_cast %27 : vector<256xf32> to vector<1x256xf32>
    %44 = tpu.concatenate %28, %29, %30, %31, %32, %33, %34, %35, %36, %37, %38, %39, %40, %41, %42, %43 in 0 : vector<1x256xf32>, vector<1x256xf32>, vector<1x256xf32>, vector<1x256xf32>, vector<1x256xf32>, vector<1x256xf32>, vector<1x256xf32>, vector<1x256xf32>, vector<1x256xf32>, vector<1x256xf32>, vector<1x256xf32>, vector<1x256xf32>, vector<1x256xf32>, vector<1x256xf32>, vector<1x256xf32>, vector<1x256xf32> -> vector<16x256xf32>
    %c0_39 = arith.constant 0 : index
    %c0_40 = arith.constant 0 : index
    %45 = vector.load %arg3[%c0_39, %c0_40] : memref<8x16xf32, #tpu.memory_space<vmem>>, vector<8x16xf32>
    %cst_41 = arith.constant dense<0.000000e+00> : vector<8x256xf32>
    %46 = tpu.matmul %45, %44, %cst_41 {dimension_numbers = #tpu.dot_dimension_numbers<[1], [0], [0], [1], [0, 0, 1, 1], [], []>} : vector<8x16xf32>, vector<16x256xf32>, vector<8x256xf32> -> vector<8x256xf32>
    %cst_42 = arith.constant 0.00999999977 : f32
    %47 = vector.broadcast %cst_42 : f32 to vector<8x256xf32>
    %48 = arith.mulf %47, %46 : vector<8x256xf32>
    %49 = arith.maximumf %46, %48 : vector<8x256xf32>
    %c0_43 = arith.constant 0 : index
    %c0_44 = arith.constant 0 : index
    %c0_45 = arith.constant 0 : index
    %50 = vector.load %arg4[%c0_43, %c0_44, %c0_45] : memref<1x8x8xf32, #tpu.memory_space<vmem>>, vector<1x8x8xf32>
    %51 = vector.shape_cast %50 : vector<1x8x8xf32> to vector<8x8xf32>
    %cst_46 = arith.constant dense<0.000000e+00> : vector<8x256xf32>
    %52 = tpu.matmul %51, %49, %cst_46 {dimension_numbers = #tpu.dot_dimension_numbers<[1], [0], [0], [1], [0, 0, 1, 1], [], []>} : vector<8x8xf32>, vector<8x256xf32>, vector<8x256xf32> -> vector<8x256xf32>
    %c0_47 = arith.constant 0 : index
    %c0_48 = arith.constant 0 : index
    %c0_49 = arith.constant 0 : index
    %53 = vector.load %arg5[%c0_47, %c0_48, %c0_49] : memref<1x8x1xf32, #tpu.memory_space<vmem>>, vector<1x8x1xf32>
    %54 = vector.shape_cast %53 : vector<1x8x1xf32> to vector<8x1xf32>
    %55 = vector.broadcast %54 : vector<8x1xf32> to vector<8x256xf32>
    %56 = arith.addf %52, %55 : vector<8x256xf32>
    %cst_50 = arith.constant 0.00999999977 : f32
    %57 = vector.broadcast %cst_50 : f32 to vector<8x256xf32>
    %58 = arith.mulf %57, %56 : vector<8x256xf32>
    %59 = arith.maximumf %56, %58 : vector<8x256xf32>
    %c0_51 = arith.constant 0 : index
    %c0_52 = arith.constant 0 : index
    %60 = vector.load %arg6[%c0_51, %c0_52] : memref<8x8xf32, #tpu.memory_space<vmem>>, vector<8x8xf32>
    %cst_53 = arith.constant dense<0.000000e+00> : vector<8x256xf32>
    %61 = tpu.matmul %60, %59, %cst_53 {dimension_numbers = #tpu.dot_dimension_numbers<[1], [0], [0], [1], [0, 0, 1, 1], [], []>} : vector<8x8xf32>, vector<8x256xf32>, vector<8x256xf32> -> vector<8x256xf32>
    %c0_54 = arith.constant 0 : index
    %c0_55 = arith.constant 0 : index
    %62 = vector.load %arg7[%c0_54, %c0_55] : memref<8x1xf32, #tpu.memory_space<vmem>>, vector<8x1xf32>
    %63 = vector.broadcast %62 : vector<8x1xf32> to vector<8x256xf32>
    %64 = arith.addf %61, %63 : vector<8x256xf32>
    %cst_56 = arith.constant -1.000000e+00 : f32
    %cst_57 = arith.constant 1.000000e+00 : f32
    %65 = vector.broadcast %cst_56 : f32 to vector<8x256xf32>
    %66 = arith.maximumf %65, %64 : vector<8x256xf32>
    %67 = vector.broadcast %cst_57 : f32 to vector<8x256xf32>
    %68 = arith.minimumf %67, %66 : vector<8x256xf32>
    %c0_58 = arith.constant 0 : index
    %c0_59 = arith.constant 0 : index
    %c0_60 = arith.constant 0 : index
    %c0_61 = arith.constant 0 : index
    %69 = vector.load %arg8[%c0_58, %c0_59, %c0_60, %c0_61] : memref<1x1x8x256xf32, #tpu.memory_space<vmem>>, vector<1x1x8x256xf32>
    %70 = vector.shape_cast %69 : vector<1x1x8x256xf32> to vector<8x256xf32>
    %71 = vector.shape_cast %68 : vector<8x256xf32> to vector<1x1x8x256xf32>
    tpu.vector_store %arg8[%c0_58, %c0_59, %c0_60, %c0_61], %71 {strides = array<i32>} : memref<1x1x8x256xf32, #tpu.memory_space<vmem>>, vector<1x1x8x256xf32>,
    return
  }
  func.func @transform_0(%arg0: i32, %arg1: i32) -> (i32, i32, i32, i32) {
    %c0_i32 = arith.constant 0 : i32
    %c0_i32_0 = arith.constant 0 : i32
    %c0_i32_1 = arith.constant 0 : i32
    return %arg0, %arg1, %c0_i32, %c0_i32_0 : i32, i32, i32, i32
  }
  func.func @transform_1(%arg0: i32, %arg1: i32) -> (i32, i32) {
    %c0_i32 = arith.constant 0 : i32
    %c0_i32_0 = arith.constant 0 : i32
    %c0_i32_1 = arith.constant 0 : i32
    return %c0_i32, %c0_i32_0 : i32, i32
  }
  func.func @transform_2(%arg0: i32, %arg1: i32) -> (i32, i32, i32) {
    %c0_i32 = arith.constant 0 : i32
    %c0_i32_0 = arith.constant 0 : i32
    %c0_i32_1 = arith.constant 0 : i32
    %c0_i32_2 = arith.constant 0 : i32
    return %c0_i32, %c0_i32_0, %c0_i32_1 : i32, i32, i32
  }
  func.func @transform_3(%arg0: i32, %arg1: i32) -> (i32, i32, i32) {
    %c0_i32 = arith.constant 0 : i32
    %c0_i32_0 = arith.constant 0 : i32
    %c0_i32_1 = arith.constant 0 : i32
    %c0_i32_2 = arith.constant 0 : i32
    return %c0_i32, %c0_i32_0, %c0_i32_1 : i32, i32, i32
  }
  func.func @transform_4(%arg0: i32, %arg1: i32) -> (i32, i32) {
    %c0_i32 = arith.constant 0 : i32
    %c0_i32_0 = arith.constant 0 : i32
    %c0_i32_1 = arith.constant 0 : i32
    return %c0_i32, %c0_i32_0 : i32, i32
  }
  func.func @transform_5(%arg0: i32, %arg1: i32) -> (i32, i32) {
    %c0_i32 = arith.constant 0 : i32
    %c0_i32_0 = arith.constant 0 : i32
    %c0_i32_1 = arith.constant 0 : i32
    return %c0_i32, %c0_i32_0 : i32, i32
  }
  func.func @transform_6(%arg0: i32, %arg1: i32) -> (i32, i32, i32, i32) {
    %c0_i32 = arith.constant 0 : i32
    %c0_i32_0 = arith.constant 0 : i32
    %c0_i32_1 = arith.constant 0 : i32
    return %arg0, %arg1, %c0_i32, %c0_i32_0 : i32, i32, i32, i32
  }
}

</mosaic_0001>

<bundles_post_ra>
// kernel: tpu_custom_call.1
= control target key start
LH: loop header
LB: loop body
LE: loop exit
PB: predicated region body
PF: predicated region fallthrough
CT: control target
= control target key end

     0   :  { %11 = vsyncpa [#allocation3], 0  ;;  %s1438_s0 = inlined_call_operand.vmem [shape: f32[2,2,1,324], index: 0, kind: input, shape index: {}]   ;;  %s1439_s1 = inlined_call_operand.hbm [shape: f32[8,16], index: 1, kind: input, shape index: {}]   ;;  %s1440_s2 = inlined_call_operand.vmem [shape: f32[1,8,8], index: 2, kind: input, shape index: {}]   ;;  %s1441_s3 = inlined_call_operand.vmem [shape: f32[1,8,1], index: 3, kind: input, shape index: {}]   ;;  %s1442_s4 = inlined_call_operand.hbm [shape: f32[8,8], index: 4, kind: input, shape index: {}]   ;;  %s1443_s5 = inlined_call_operand.vmem [shape: f32[8,1], index: 5, kind: input, shape index: {}]   ;;  %s1444_s6 = inlined_call_operand.hbm [shape: f32[2,2,8,256], index: 6, kind: output, shape index: {}]  }
   0x1   :  { %12 = vsyncpa [#allocation6], 0 }
   0x2   :  { %13 = vsyncpa [#allocation4], 0 }
   0x3   :  { %15 = vsyncpa [#allocation4 + $0x1], 0  ;;  %s1191_s21 = smov 0   ;;  %s1193_s22 = smov 0  }
   0x4   :  { %s1195_s23 = smov 0   ;;  %s1197_s24 = smov 0  }
   0x5   :  { %s1199_s25 = smov 0   ;;  %s1201_s26 = smov 0  }
   0x6   :  { %s1203_s27 = smov 0   ;;  %s1205_s28 = smov 0  }
   0x7 LB: > { %s854_s29 = sadd.s32 4294967295, %s1138_s28   ;;  %s855_s30 = sadd.s32 4294967294, %s1138_s28   ;;  %s1138_s28 = sphi %s1205_s28, %s21_s28   ;;  %s1134_s27 = sphi %s1203_s27, %s1462_s27   ;;  %s1130_s26 = sphi %s1201_s26, %s1461_s26   ;;  %s1126_s25 = sphi %s1199_s25, %s1460_s25   ;;  %s1122_s24 = sphi %s1197_s24, %s1459_s24   ;;  %s1118_s23 = sphi %s1195_s23, %s1458_s23   ;;  %s1114_s22 = sphi %s1193_s22, %s1457_s22   ;;  %s1110_s21 = sphi %s1191_s21, %s1456_s21  }
   0x8   : > { %s30_s7 = sadd.s32 1, %s1130_s26  ;;  %s33_s8 = sadd.s32 1, %s1134_s27 }
   0x9   : > { %p31_p0 = scmp.ge.s32.totalorder %s30_s7, 2  ;;  %s175_s9 = sadd.s32 1, %s1118_s23 }
   0xa   : > { %p185_p1 = scmp.ne.s32.totalorder %s1118_s23, %s1114_s22  ;;  %p186_p2 = scmp.eq.s32.totalorder %s854_s29, 3 }
   0xb   : > { %s1464_s7 = smov (%p31_p0, %s30_s7), 0  ;;  %s1466_s8 = smov (!%p31_p0, %s33_s8), %s1134_s27 }
   0xc   : > { %s171_s10 = ssub.s32 %s1130_s26, %s1464_s7  ;;  %p1243_p3 = por %p186_p2, %p185_p1 }
   0xd   : > { %p35_p4 = scmp.ge.s32.totalorder %s1466_s8, 2  ;;  %p191_p5 = scmp.ne.s32.totalorder %s1114_s22, %s1110_s21 }
   0xe   : > { %s1448_s11 = scalar_select %p1243_p3, 1, 0 }
   0xf   : > { %p192_p6 = scmp.eq.s32.totalorder %s855_s30, 3  ;;  %p856_p7 = scmp.ge.s32.totalorder %s1138_s28, 1 }
  0x10   : > { %s1468_s8 = smov (%p35_p4, %s1466_s8), 0  ;;  %p199_p9 = scmp.lt.s32.totalorder %s1138_s28, 5 }
  0x11   : > { %p1252_p8 = por %p192_p6, %p191_p5  ;;  %s170_s13 = ssub.s32 %s1134_s27, %s1468_s8 }
  0x12   : > { %s172_s14 = sor.u32 %s171_s10, %s170_s13  ;;  %p1259_p10 = pnand %p856_p7, %p199_p9 }
  0x13   : > { %s1449_s12 = scalar_select %p1252_p8, 1, 0 }
  0x14   : > { %p173_p11 = scmp.eq.s32.totalorder %s172_s14, 0  ;;  %p1263_p12 = scmp.eq.s32.totalorder %s854_s29, 0 }
  0x15   : > { %p889_p13 = pneg %p1259_p10  ;;  %s1140_s18 = smov [#allocation2]  }
  0x16   : > { %s1451_s16 = scalar_select %p1263_p12, 1, 0 }
  0x17   : > { %s1270_s17 = scalar_select %p173_p11, %s1118_s23, %s175_s9  }
  0x18   : > { %s212_s19 = sshll.u32 %s1140_s18, 4  ;;  %p1274_p0 = pnand %p1263_p12, %p889_p13  ;;  %s213_s19 = int_to_ptr.vmem [resolvable:$true] %s212_s19 }
  0x19   : > { %s1141_s30 = smov [#allocation5]   ;;  %s997_s10 = scalar_lea.vmem %s213_s19, 128 }
  0x1a   : > { %s229_s29 = sshll.u32 %s1141_s30, 4  ;;  %p988_p1 = pneg %p1274_p0  ;;  %s230_s29 = int_to_ptr.vmem [resolvable:$true] %s229_s29 }
  0x1b   : > { %p998_p2 = scmp.ne.s32.totalorder %s213_s19, %s997_s10  ;;  %p1005_p6 = scmp.lt.s32.totalorder %s213_s19, %s213_s19 }
  0x1c   : > { %p1006_p7 = scmp.lt.s32.totalorder %s997_s10, %s997_s10 }
  0x1d   : > { %p1000_p4 = pnand %p998_p2, %p988_p1 }
  0x1e   : > { %p1007_p9 = por %p1006_p7, %p1005_p6 }
  0x1f   : > { %p1001_p5 = pneg %p1000_p4 }
  0x21   : > { %p1008_p11 = pnand %p1007_p9, %p1001_p5 }
  0x23   : > { %1011 = shalt.err (!%p1008_p11)
}
  0x24   : > { %892 = dma.hbm_to_vmem [thread:$0]  (!%p1274_p0), %s1439_s1, 128, %s213_s19, [#allocation3]  }
  0x25   : > { %s1023_s14 = scalar_lea.vmem %s230_s29, 128  ;;  %p1031_p4 = scmp.lt.s32.totalorder %s230_s29, %s230_s29 }
  0x26   : > { %p1024_p13 = scmp.ne.s32.totalorder %s230_s29, %s1023_s14  ;;  %p1032_p3 = scmp.lt.s32.totalorder %s1023_s14, %s1023_s14 }
  0x28   : > { %p1026_p8 = pnand %p1024_p13, %p988_p1  ;;  %p1033_p12 = por %p1032_p3, %p1031_p4 }
  0x2a   : > { %p1027_p2 = pneg %p1026_p8 }
  0x2c   : > { %p1034_p6 = pnand %p1033_p12, %p1027_p2 }
  0x2e   : > { %1037 = shalt.err (!%p1034_p6)
}
  0x2f   : > { %895 = dma.hbm_to_vmem [thread:$0]  (!%p1274_p0), %s1442_s4, 128, %s230_s29, [#allocation6]  }
  0x30   : > { %256 = sbr.rel (%p1259_p10) target bundleno = 866 (0x362), region = 44  ;;  %p1453_p5 = scmp.ne.s32.totalorder (!%p1259_p10), %s1451_s16, 0 }
  0x35   : > { %1097 = dma.done.wait (%p1453_p5), [#allocation3], 128  }
  0x36   : > { %1099 = vsyncadd (%p1453_p5), [#allocation3], 4294967168 }
  0x37   : > { %1101 = dma.done.wait (%p1453_p5), [#allocation6], 128  }
  0x38   : > { %1103 = vsyncadd (%p1453_p5), [#allocation6], 4294967168  ;;  %p293_p3 = scmp.lt.s32.totalorder %s1126_s25, 1  ;;  %p295_p8 = scmp.lt.s32.totalorder %s1122_s24, 1  ;;  %v304_v0 = vlaneseq  ;;  %v1152_v12 = vmov 0.0   ;;  %vm421_vm0 = vcmask 752640  }
  0x39   : > { %s1142_s16 = smov 92   ;;  %s1143_s18 = smov 93   ;;  %552 = vmatprep.mubr.f32.mxu0 %v1152_v12  ;;  %638 = vmatprep.mubr.f32.mxu1 %v1152_v12  ;;  %vm410_vm1 = vcmask 760832   ;;  %vm432_vm2 = vcmask 523264   ;;  %vm448_vm3 = vcmask 1040384   ;;  %vm451_vm4 = vcmask 1041408  }
  0x3a   : > { %s294_s15 = scalar_select %p293_p3, %s1126_s25, 1  ;;  %v305_v1 = vshrl.u32 %v304_v0, 7  ;;  %vm443_vm5 = vcmask 515072   ;;  %vm454_vm6 = vcmask 1042432   ;;  %vm457_vm7 = vcmask 1043456  }
  0x3b   : > { %s296_s19 = scalar_select %p295_p8, %s1122_s24, 1  ;;  %vm460_vm8 = vcmask 1044480   ;;  %vm463_vm9 = vcmask 1045504   ;;  %vm466_vm10 = vcmask 1046528   ;;  %vm333_vm11 = vcmask 1039360  }
  0x3c   : > { %s878_s20 = smul.u32 6, %s294_s15  ;;  %v310_v2 = vsub.s32 1, %v305_v1  ;;  %v325_v3 = vsub.s32 2, %v305_v1  ;;  %v306_v9 = vsub.s32 0, %v305_v1  ;;  %s1144_s30 = smov 127   ;;  %vm344_vm12 = vcmask 1031168  }
  0x3d   : > { %s877_s29 = smul.u32 3, %s296_s19  ;;  %s1145_s15 = smov 64   ;;  %vm355_vm13 = vcmask 1022976   ;;  %vm366_vm14 = vcmask 1014784   ;;  %vm377_vm15 = vcmask 785408  }
  0x3e   : > { %s1146_s19 = smov 126   ;;  %s1150_s9 = smov 96  }
  0x3f   : > { %s299_s10 = sadd.s32 %s878_s20, %s877_s29  ;;  %s1147_s20 = smov 63  }
  0x40   : > { %s300_s14 = scalar_lea.vmem %s1438_s0, %s299_s10  ;;  %s1148_s29 = smov 125  }
  0x41   : > { %v302_v4 = vld [vmem:[%s300_s14] sm:$0x7]  ;;  %s1149_s10 = smov 124   ;;  %s1151_s13 = smov 95  }
  0x42   : > { %v301_v5 = vld [vmem:[%s300_s14] sm:$0x3]  ;;  %v322_v6 = vrot.slane %v302_v4, %v310_v2  ;;  %v326_v8 = vrot.slane %v302_v4, %v325_v3  ;;  %v318_v11 = vrot.slane %v302_v4, %v306_v9  ;;  %s1153_s14 = smov 94   ;;  %p1454_p12 = scmp.ne.s32.totalorder %s1448_s11, 0 }
  0x43   : > { %v1313_v7 = vrot.slane %v301_v5, %v310_v2  ;;  %v1315_v10 = vrot.slane %v301_v5, %v306_v9 }
  0x44   : > { %417 = vrot.lane.b32.xlu1 %v322_v6, %s1142_s16  ;;  %406 = vrot.lane.b32.xlu0 %v322_v6, %s1143_s18 }
  0x48   : > { %419 = vrot.lane.b32.xlu1 %v326_v8, %s1142_s16  ;;  %408 = vrot.lane.b32.xlu0 %v326_v8, %s1143_s18 }
  0x4c   : > { %331 = vrot.lane.b32.xlu1 %v326_v8, %s1144_s30  ;;  %329 = vrot.lane.b32.xlu0 %v322_v6, %s1144_s30 }
  0x50   : > { %415 = vrot.lane.b32.xlu1 %v318_v11, %s1142_s16  ;;  %404 = vrot.lane.b32.xlu0 %v318_v11, %s1143_s18 }
  0x54   : > { %430 = vrot.lane.b32.xlu1 %v326_v8, %s1145_s15  ;;  %428 = vrot.lane.b32.xlu0 %v322_v6, %s1145_s15 }
  0x58   : > { %340 = vrot.lane.b32.xlu1 %v322_v6, %s1146_s19  ;;  %327 = vrot.lane.b32.xlu0 %v318_v11, %s1144_s30 }
  0x5c   : > { %426 = vrot.lane.b32.xlu1 %v318_v11, %s1145_s15  ;;  %342 = vrot.lane.b32.xlu0 %v326_v8, %s1146_s19 }
  0x60   : > { %441 = vrot.lane.b32.xlu1 %v326_v8, %s1147_s20  ;;  %439 = vrot.lane.b32.xlu0 %v322_v6, %s1147_s20 }
  0x64   : > { %351 = vrot.lane.b32.xlu1 %v322_v6, %s1148_s29  ;;  %338 = vrot.lane.b32.xlu0 %v318_v11, %s1146_s19 }
  0x68   : > { %437 = vrot.lane.b32.xlu1 %v318_v11, %s1147_s20  ;;  %353 = vrot.lane.b32.xlu0 %v326_v8, %s1148_s29 }
  0x6c   : > { %362 = vrot.lane.b32.xlu1 %v322_v6, %s1149_s10  ;;  %349 = vrot.lane.b32.xlu0 %v318_v11, %s1148_s29  ;;  %s290_s29 = sand.u32 1, %s1114_s22  }
  0x70   : > { %360 = vrot.lane.b32.xlu1 %v318_v11, %s1149_s10  ;;  %364 = vrot.lane.b32.xlu0 %v326_v8, %s1149_s10  ;;  %s863_s10 = sshll.u32 %s290_s29, 4 }
  0x71   : > { %s292_s18 = scalar_lea.vmem [#allocation7], %s863_s10 }
  0x72   : > { %s753_s30 = sshll.u32 %s292_s18, 4  ;;  %s754_s30 = int_to_ptr.vmem [resolvable:$true] %s753_s30 }
  0x74   : > { %375 = vrot.lane.b32.xlu1 %v326_v8, %s1150_s9  ;;  %373 = vrot.lane.b32.xlu0 %v322_v6, %s1150_s9 }
  0x78   : > { %384 = vrot.lane.b32.xlu1 %v322_v6, %s1151_s13  ;;  %371 = vrot.lane.b32.xlu0 %v318_v11, %s1150_s9  ;;  %s872_s9 = sshll.u32 %s1122_s24, 1  ;;  %s737_s24 = scalar_lea.sflag [#allocation4], %s290_s29 }
  0x7c   : > { %382 = vrot.lane.b32.xlu1 %v318_v11, %s1151_s13  ;;  %386 = vrot.lane.b32.xlu0 %v326_v8, %s1151_s13  ;;  %s873_s13 = sshll.u32 %s1126_s25, 2  ;;  %s1038_s25 = scalar_lea.vmem %s754_s30, 256 }
  0x7d   : > { %p1039_p10 = scmp.ne.s32.totalorder %s754_s30, %s1038_s25 }
  0x7f   : > { %p1040_p0 = pnand %p1039_p10, %p1454_p12 }
  0x80   : > { %397 = vrot.lane.b32.xlu1 %v326_v8, %s1153_s14  ;;  %395 = vrot.lane.b32.xlu0 %v322_v6, %s1153_s14 }
  0x81   : > { %p1041_p1 = pneg %p1040_p0 }
  0x84   : > { %393 = vrot.lane.b32.xlu0 %v318_v11, %s1153_s14  ;;  %s749_s14 = sadd.s32 %s873_s13, %s872_s9  ;;  %s1155_s9 = smov [#allocation7]  }
  0x85   : > { %s874_s16 = sshll.u32 %s749_s14, 7  ;;  %s1042_s13 = sshll.u32 %s1155_s9, 4  ;;  %s1043_s13 = int_to_ptr.vmem [resolvable:$false] %s1042_s13 }
  0x86   : > { %s751_s20 = scalar_lea.hbm %s1444_s6, %s874_s16  ;;  %s1044_s10 = scalar_lea.vmem %s1043_s13, 512 }
  0x87   : > { %p1045_p7 = scmp.lt.s32.totalorder %s754_s30, %s1043_s13  ;;  %p1046_p9 = scmp.lt.s32.totalorder %s1044_s10, %s1038_s25 }
  0x89   : > { %p1047_p11 = por %p1046_p9, %p1045_p7 }
  0x8b   : > { %p1048_p13 = pnand %p1047_p11, %p1041_p1 }
  0xb6   : > { %v418_v13 = vpop.permute.xlu1 %417  ;;  %v407_v14 = vpop.permute.xlu0 %406 }
  0xba   : > { %v420_v15 = vpop.permute.xlu1 %419  ;;  %v409_v16 = vpop.permute.xlu0 %408 }
  0xbb   : > { %v423_v27 = vsel %vm421_vm0, %v418_v13, %v420_v15  ;;  %v412_v28 = vsel %vm410_vm1, %v407_v14, %v409_v16 }
  0xbc   : > { %v470_v30 = vsel %vm448_vm3, %v412_v28, %v423_v27 }
  0xbe   : > { %v332_v17 = vpop.permute.xlu1 %331  ;;  %v1319_v18 = vpop.permute.xlu0 %329 }
  0xbf   : > { %v335_v61 = vsel %vm333_vm11, %v1319_v18, %v332_v17 }
  0xc0   : > { %v450_v0 = vsel %vm448_vm3, %v1313_v7, %v335_v61 }
  0xc2   : > { %v416_v19 = vpop.permute.xlu1 %415  ;;  %v405_v20 = vpop.permute.xlu0 %404 }
  0xc3   : > { %v422_v40 = vsel %vm421_vm0, %v416_v19, %v418_v13  ;;  %v411_v41 = vsel %vm410_vm1, %v405_v20, %v407_v14  ;;  %vm388_vm0 = vcmask 777216   ;;  %vm399_vm1 = vcmask 769024  }
  0xc4   : > { %v469_v44 = vsel %vm448_vm3, %v411_v41, %v422_v40  ;;  %v563_v40 = vld [vmem:[%s1440_s2] sm:$0xff] }
  0xc5   : > { %v650_v41 = vld [vmem:[%s1443_s5] sm:$0xff] }
  0xc6   : > { %v431_v21 = vpop.permute.xlu1 %430  ;;  %v429_v22 = vpop.permute.xlu0 %428 }
  0xc7   : > { %v434_v29 = vsel %vm432_vm2, %v429_v22, %v431_v21 }
  0xc8   : > { %v472_v33 = vsel %vm451_vm4, %v470_v30, %v434_v29  ;;  %v483_v30 = vld [vmem:[#allocation2] sm:$0xff] }
  0xca   : > { %v1321_v23 = vpop.permute.xlu1 %340  ;;  %v1323_v24 = vpop.permute.xlu0 %327 }
  0xcb   : > { %v334_v4 = vsel %vm333_vm11, %v1323_v24, %v1319_v18 }
  0xcc   : > { %v449_v14 = vsel %vm448_vm3, %v1315_v10, %v334_v4  ;;  %vm570_vm3 = vcmask 64512  }
  0xce   : > { %v427_v25 = vpop.permute.xlu1 %426  ;;  %v343_v26 = vpop.permute.xlu0 %342 }
  0xcf   : > { %v433_v43 = vsel %vm432_vm2, %v427_v25, %v429_v22  ;;  %v346_v62 = vsel %vm344_vm12, %v1321_v23, %v343_v26  ;;  %vm484_vm2 = vcmask 130048  }
  0xd0   : > { %v471_v47 = vsel %vm451_vm4, %v469_v44, %v433_v43  ;;  %v453_v5 = vsel %vm451_vm4, %v450_v0, %v346_v62 }
  0xd2   : > { %v442_v31 = vpop.permute.xlu1 %441  ;;  %v440_v32 = vpop.permute.xlu0 %439 }
  0xd3   : > { %v445_v34 = vsel %vm443_vm5, %v440_v32, %v442_v31 }
  0xd4   : > { %v474_v35 = vsel %vm454_vm6, %v472_v33, %v445_v34  ;;  %v1154_v33 = vmov 0  }
  0xd5   : > { %v476_v36 = vsel %vm457_vm7, %v474_v35, 1.0  ;;  %984 = vset.pattern.permute.xlu1 %v1154_v33  ;;  %985 = vset.pattern.permute.xlu0 %v1154_v33 }
  0xd6   : > { %v352_v37 = vpop.permute.xlu1 %351  ;;  %v339_v38 = vpop.permute.xlu0 %338  ;;  %v478_v39 = vsel %vm460_vm8, %v476_v36, 0.0  ;;  %653 = vperm.xlu0 %985, %v650_v41  }
  0xd7   : > { %v480_v42 = vsel %vm463_vm9, %v478_v39, 0.0  ;;  %v345_v8 = vsel %vm344_vm12, %v339_v38, %v1321_v23 }
  0xd8   : > { %864 = vmatprep.subr.msk.mxu0 %vm466_vm10, %v480_v42  ;;  %v452_v19 = vsel %vm451_vm4, %v449_v14, %v345_v8 }
  0xda   : > { %v438_v45 = vpop.permute.xlu1 %437  ;;  %v354_v46 = vpop.permute.xlu0 %353 }
  0xdb   : > { %v444_v48 = vsel %vm443_vm5, %v438_v45, %v440_v32  ;;  %v357_v63 = vsel %vm355_vm13, %v352_v37, %v354_v46  ;;  %v564_v32 = vld [vmem:[%s1441_s3] sm:$0xff] }
  0xdc   : > { %v473_v49 = vsel %vm454_vm6, %v471_v47, %v444_v48  ;;  %v456_v9 = vsel %vm454_vm6, %v453_v5, %v357_v63  ;;  %567 = vperm.xlu1 %984, %v564_v32  }
  0xdd   : > { %v475_v50 = vsel %vm457_vm7, %v473_v49, 1.0 }
  0xde   : > { %v363_v51 = vpop.permute.xlu1 %362  ;;  %v350_v52 = vpop.permute.xlu0 %349  ;;  %v477_v53 = vsel %vm460_vm8, %v475_v50, 0.0 }
  0xdf   : > { %v479_v54 = vsel %vm463_vm9, %v477_v53, 0.0  ;;  %v356_v7 = vsel %vm355_vm13, %v350_v52, %v352_v37 }
  0xe0   : > { %865 = vmatpush1.msk.msra.mxu0 %vm466_vm10, %v479_v54  ;;  %v455_v23 = vsel %vm454_vm6, %v452_v19, %v356_v7 }
  0xe2   : > { %v361_v55 = vpop.permute.xlu1 %360  ;;  %v365_v56 = vpop.permute.xlu0 %364 }
  0xe3   : > { %v368_v1 = vsel %vm366_vm14, %v363_v51, %v365_v56  ;;  %v367_v15 = vsel %vm366_vm14, %v361_v55, %v363_v51  ;;  %v649_v51 = vld [vmem:[#allocation5] sm:$0xff] }
  0xe4   : > { %v459_v13 = vsel %vm457_vm7, %v456_v9, %v368_v1  ;;  %v458_v25 = vsel %vm457_vm7, %v455_v23, %v367_v15 }
  0xe6   : > { %v376_v57 = vpop.permute.xlu1 %375  ;;  %v374_v58 = vpop.permute.xlu0 %373 }
  0xe7   : > { %v379_v6 = vsel %vm377_vm15, %v374_v58, %v376_v57 }
  0xe8   : > { %v462_v16 = vsel %vm460_vm8, %v459_v13, %v379_v6 }
  0xea   : > { %v385_v59 = vpop.permute.xlu1 %384  ;;  %v372_v60 = vpop.permute.xlu0 %371 }
  0xeb   : > { %v378_v20 = vsel %vm377_vm15, %v372_v60, %v374_v58 }
  0xec   : > { %v461_v26 = vsel %vm460_vm8, %v458_v25, %v378_v20 }
  0xee   : > { %v383_v2 = vpop.permute.xlu1 %382  ;;  %v387_v3 = vpop.permute.xlu0 %386 }
  0xef   : > { %v390_v11 = vsel %vm388_vm0, %v385_v59, %v387_v3  ;;  %v389_v24 = vsel %vm388_vm0, %v383_v2, %v385_v59 }
  0xf0   : > { %v465_v22 = vsel %vm463_vm9, %v462_v16, %v390_v11  ;;  %v464_v29 = vsel %vm463_vm9, %v461_v26, %v389_v24 }
  0xf2   : > { %v398_v17 = vpop.permute.xlu1 %397  ;;  %v396_v18 = vpop.permute.xlu0 %395 }
  0xf3   : > { %v401_v21 = vsel %vm399_vm1, %v396_v18, %v398_v17 }
  0xf4   : > { %v468_v10 = vsel %vm466_vm10, %v465_v22, %v401_v21 }
  0xf5   : > { %518 = vmatprep.subr.mxu0 %v468_v10 }
  0xf6   : > { %v394_v27 = vpop.permute.xlu0 %393 }
  0xf7   : > { %v400_v28 = vsel %vm399_vm1, %v394_v27, %v396_v18 }
  0xf8   : > { %v467_v31 = vsel %vm466_vm10, %v464_v29, %v400_v28 }
  0xf9   : > { %519 = vmatpush1.msra.mxu0 %v467_v31 }
  0xfa   : > { %866 = vmatmul.mubr.msk.f32.vlgmr.msra.gmra.mxu0 %vm484_vm2, %v483_v30 }
 0x157   : > { %v568_v42 = vpop.permute.xlu1 %567 }
 0x1ba   : > { %v554_v34 = vpop.f32.mrf.mxu0 }
 0x1bb   : > { %v559_v35 = vmul.f32 0.01, %v554_v34 }
 0x1bc   : > { %v556_v36 = vpop.f32.mrf.mxu0 }
 0x1bd   : > { %v560_v37 = vmul.f32 0.01, %v556_v36  ;;  %v561_v39 = vmax.f32 %v554_v34, %v559_v35 }
 0x1bf   : > { %v562_v38 = vmax.f32 %v556_v36, %v560_v37 }
 0x1c1   : > { %604 = vmatprep.subr.mxu1 %v562_v38 }
 0x1c2   : > { %605 = vmatpush1.msra.mxu1 %v561_v39 }
 0x1c3   : > { %867 = vmatmul.mubr.msk.f32.vlgmr.msra.gmra.mxu1 %vm570_vm3, %v563_v40 }
 0x1c4   : > { %723 = vmatprep.mubr.f32.mxu1 %v1152_v12  ;;  %v654_v12 = vpop.permute.xlu0 %653 }
 0x283   : > { %v640_v43 = vpop.f32.mrf.mxu1 }
 0x284   : > { %v641_v44 = vadd.f32 %v640_v43, %v568_v42 }
 0x285   : > { %v642_v45 = vpop.f32.mrf.mxu1 }
 0x286   : > { %v643_v46 = vadd.f32 %v642_v45, %v568_v42  ;;  %v645_v47 = vmul.f32 0.01, %v641_v44 }
 0x288   : > { %v646_v48 = vmul.f32 0.01, %v643_v46  ;;  %v647_v50 = vmax.f32 %v641_v44, %v645_v47 }
 0x28a   : > { %v648_v49 = vmax.f32 %v643_v46, %v646_v48 }
 0x28c   : > { %689 = vmatprep.subr.mxu1 %v648_v49 }
 0x28d   : > { %690 = vmatpush1.msra.mxu1 %v647_v50 }
 0x28e   : > { %868 = vmatmul.mubr.msk.f32.vlgmr.msra.gmra.mxu1 %vm570_vm3, %v649_v51 }
 0x34e   : > { %v725_v52 = vpop.f32.mrf.mxu1 }
 0x34f   : > { %v726_v53 = vadd.f32 %v725_v52, %v654_v12 }
 0x350   : > { %v727_v54 = vpop.f32.mrf.mxu1 }
 0x351   : > { %v869_v55 = vclamps-f32 %v726_v53, 1.0  ;;  %v728_v56 = vadd.f32 %v727_v54, %v654_v12 }
 0x353   : > { %734 = vst [vmem:[%s292_s18] sm:$0xff] %v869_v55  ;;  %v870_v57 = vclamps-f32 %v728_v56, 1.0 }
 0x355   : > { %735 = vst [vmem:[%s292_s18 + $0x8] sm:$0xff] %v870_v57 }
 0x356   : > { %1051 = shalt.err (!%p1048_p13)
}
 0x357   : > { %s1052_s14 = scalar_lea.hbm %s751_s20, 256  ;;  %s1056_s18 = scalar_lea.hbm %s1444_s6, 1024 }
 0x358   : > { %p1053_p2 = scmp.ne.s32.totalorder %s751_s20, %s1052_s14  ;;  %p1057_p5 = scmp.lt.s32.totalorder %s751_s20, %s1444_s6 }
 0x359   : > { %p1058_p3 = scmp.lt.s32.totalorder %s1056_s18, %s1052_s14 }
 0x35a   : > { %p1054_p4 = pnand %p1053_p2, %p1454_p12 }
 0x35b   : > { %p1059_p8 = por %p1058_p3, %p1057_p5 }
 0x35c   : > { %p1055_p6 = pneg %p1054_p4 }
 0x35e   : > { %p1060_p10 = pnand %p1059_p8, %p1055_p6 }
 0x360   : > { %1063 = shalt.err (!%p1060_p10)
}
 0x361   : > { %887 = dma.vmem_to_hbm [thread:$0]  (%p1454_p12), %s754_s30, 256, %s751_s20, %s737_s24  }
 0x362 PF: > { %p904_p0 = scmp.ge.s32.totalorder %s1138_s28, 2  ;;  %s765_s25 = sand.u32 1, %s1110_s21  }
 0x363   : > { %p1455_p1 = scmp.ne.s32.totalorder %s1449_s12, 0  ;;  %s766_s9 = scalar_lea.sflag [#allocation4], %s765_s25 }
 0x365   : > { %p897_p7 = pnand %p904_p0, %p1455_p1 }
 0x367   : > { %p898_p9 = pneg %p897_p7 }
 0x369   : > { %1105 = dma.done.wait (%p898_p9), %s766_s9, 256  }
 0x36a   : > { %1107 = vsyncadd (%p898_p9), %s766_s9, 4294967040  ;;  %s21_s28 = sadd.s32 1, %s1138_s28   ;;  %s1456_s21 = smov %s1114_s22 }
 0x36b   : > { %p18_p11 = scmp.ge.s32.totalorder %s21_s28, 6   ;;  %s1457_s22 = smov %s1118_s23 }
 0x36c   : > { %s1458_s23 = smov %s1270_s17  ;;  %s1459_s24 = smov %s1130_s26 }
 0x36d   : > { %s1460_s25 = smov %s1134_s27  ;;  %s1461_s26 = smov %s1464_s7 }
 0x36e   : > { %s1462_s27 = smov %s1468_s8  ;;  %20 = sbr.rel (!%p18_p11) target bundleno = 7 (0x7), region = 88 }
 0x373   :  { %771 = vsyncpa [#allocation3], 1 }
 0x374   :  { %773 = vsyncpa [#allocation3 + $0x1], 1 }
 0x375   :  { %774 = vsyncpa [#allocation6], 1 }
 0x376   :  { %775 = vsyncpa [#allocation4], 1 }
 0x377   :  { %777 = vsyncpa [#allocation4 + $0x1], 1 }

</bundles_post_ra>
